<compile_context>
chip_gen: v7x
topology: tpu7x:2x2x1
jax: 0.10.0
libtpu: 0.0.40
codegen_flags: <defaults>
</compile_context>

<pallas_src>
import functools

import jax
import jax.numpy as jnp
from jax.experimental import pallas as pl
from jax.experimental.pallas import tpu as pltpu


def _accuracy_ce_kernel(x_ref, t_ref, o_ref, *, n_total, tile_rows):
    i = pl.program_id(0)

    # Zero the resident accumulator on the first grid step.
    @pl.when(i == 0)
    def _():
        o_ref[...] = jnp.zeros_like(o_ref)

    # Load the tile and do the (cheap) compute in f32: safe on v5e's VPU and
    # free filler under the DMA stream on v6e/v7x.
    x = x_ref[...].astype(jnp.float32)                 # (tile_rows, C)
    tn, c = x.shape

    # Row-wise argmax with first-occurrence tie-break (matches torch.argmax).
    max_val = jnp.max(x, axis=1, keepdims=True)                       # (tn, 1)
    col_idx = jax.lax.broadcasted_iota(jnp.int32, (tn, c), 1)         # (tn, C)
    argmax_idx = jnp.min(jnp.where(x == max_val, col_idx, c),
                         axis=1, keepdims=True)                       # (tn, 1)

    correct = argmax_idx == t_ref[...]                                # (tn, 1) bool

    # Mask padded / out-of-range tail rows of the final tile.
    row_idx = i * tile_rows + jax.lax.broadcasted_iota(jnp.int32, (tn, 1), 0)
    valid = row_idx < n_total

    hits = jnp.where(correct & valid, 1.0, 0.0).astype(jnp.float32)   # (tn, 1)
    o_ref[...] += jnp.sum(hits, axis=0, keepdims=True)                # (1, 1)


def _choose_tile_rows(n_rows, n_cols, itemsize):
    # ~2 MiB of logits per tile (double-buffered by the pipeline => ~4 MiB),
    # a multiple of 8 sublanes, capped at 4096 rows.
    target_bytes = 2 * 1024 * 1024
    rows = target_bytes // max(1, n_cols * itemsize)
    rows = max(8, min(4096, (rows // 8) * 8))
    n_pad8 = -(-n_rows // 8) * 8
    return min(rows, n_pad8)


def accuracy_ce(logits: jax.Array, target: jax.Array, *, tile_rows=None) -> jax.Array:
    """Pallas equivalent of AccuracyCE.forward. Returns a scalar float32."""
    n, c = logits.shape
    itemsize = jnp.dtype(logits.dtype).itemsize

    if tile_rows is None:
        tile_rows = _choose_tile_rows(n, c, itemsize)
    else:
        tile_rows = max(8, (int(tile_rows) // 8) * 8)

    target_col = target.astype(jnp.int32).reshape(n, 1)

    # Pad the row axis to a multiple of 8 so block shapes satisfy the sublane
    # constraint; padded rows are masked out inside the kernel.
    n_pad = -(-n // 8) * 8
    if n_pad != n:
        logits = jnp.pad(logits, ((0, n_pad - n), (0, 0)))
        target_col = jnp.pad(target_col, ((0, n_pad - n), (0, 0)),
                             constant_values=-1)

    tile_rows = min(tile_rows, n_pad)
    num_tiles = pl.cdiv(n_pad, tile_rows)

    kernel = functools.partial(_accuracy_ce_kernel, n_total=n, tile_rows=tile_rows)

    out = pl.pallas_call(
        kernel,
        out_shape=jax.ShapeDtypeStruct((1, 1), jnp.float32),
        grid=(num_tiles,),
        in_specs=[
            pl.BlockSpec((tile_rows, c), lambda i: (i, 0)),
            pl.BlockSpec((tile_rows, 1), lambda i: (i, 0)),
        ],
        out_specs=pl.BlockSpec((1, 1), lambda i: (0, 0)),
        compiler_params=pltpu.CompilerParams(
            dimension_semantics=("arbitrary",),
        ),
    )(logits, target_col)
    return out[0, 0]


if __name__ == "__main__":
    key = jax.random.PRNGKey(0)
    k_x, k_t = jax.random.split(key)

    N, C = 32, 32
    x = jax.random.normal(k_x, (N, C), dtype=jnp.float32)
    target = jax.random.randint(k_t, (N,), 0, C, dtype=jnp.int32)

    # Default tiling (single tile at this size).
    result = jax.block_until_ready(accuracy_ce(x, target))
    ref = jnp.sum((jnp.argmax(x, axis=1) == target).astype(jnp.float32))
    assert jnp.allclose(result, ref), (result, ref)

    # Multi-step grid + ragged tail: exercises the accumulator and the
    # tail-row masking (27 rows, 8-row tiles -> 4 grid steps, 5 padded rows).
    x27, t27 = x[:27], target[:27]
    result27 = jax.block_until_ready(accuracy_ce(x27, t27, tile_rows=8))
    ref27 = jnp.sum((jnp.argmax(x27, axis=1) == t27).astype(jnp.float32))
    assert jnp.allclose(result27, ref27), (result27, ref27)

    # bf16 logits path (no wrapper upcast; halves HBM traffic in real use).
    xb = x.astype(jnp.bfloat16)
    result_bf16 = jax.block_until_ready(accuracy_ce(xb, target))
    ref_bf16 = jnp.sum(
        (jnp.argmax(xb.astype(jnp.float32), axis=1) == target).astype(jnp.float32))
    assert jnp.allclose(result_bf16, ref_bf16), (result_bf16, ref_bf16)

    print("KERNEL_OK")
</pallas_src>

<mosaic_0001>
module attributes {stable_mosaic.version = 11 : i64} {
  func.func @_accuracy_ce_kernel(%arg0: i32, %arg1: memref<32x32xf32, #tpu.memory_space<vmem>>, %arg2: memref<32x1xi32, #tpu.memory_space<vmem>>, %arg3: memref<1x1xf32, #tpu.memory_space<vmem>>) attributes {dimension_semantics = [#tpu.dimension_semantics<arbitrary>], iteration_bounds = array<i64: 1>, scalar_prefetch = 0 : i64, scratch_operands = 0 : i64, tpu.core_type = #tpu.core_type<tc>, window_params = [{transform_indices = @transform_0, window_bounds = array<i64: 32, 32>}, {transform_indices = @transform_1, window_bounds = array<i64: 32, 1>}, {pipeline_mode = #tpu.pipeline_mode<synchronous>, transform_indices = @transform_2, window_bounds = array<i64: 1, 1>}]} {
    %c0_i32 = arith.constant 0 : i32
    %0 = arith.cmpi eq, %arg0, %c0_i32 : i32
    %1 = arith.extui %0 : i1 to i32
    %c0_i32_0 = arith.constant 0 : i32
    %2 = arith.cmpi ne, %1, %c0_i32_0 : i32
    scf.if %2 {
      %cst_14 = arith.constant 0.000000e+00 : f32
      %30 = vector.broadcast %cst_14 : f32 to vector<1x1xf32>
      %c0_15 = arith.constant 0 : index
      %c0_16 = arith.constant 0 : index
      %31 = vector.load %arg3[%c0_15, %c0_16] : memref<1x1xf32, #tpu.memory_space<vmem>>, vector<1x1xf32>
      tpu.vector_store %arg3[%c0_15, %c0_16], %30 {strides = array<i32>} : memref<1x1xf32, #tpu.memory_space<vmem>>, vector<1x1xf32>,
    } else {
    }
    %c0 = arith.constant 0 : index
    %c0_1 = arith.constant 0 : index
    %3 = vector.load %arg1[%c0, %c0_1] : memref<32x32xf32, #tpu.memory_space<vmem>>, vector<32x32xf32>
    %cst = arith.constant dense<0xFF800000> : vector<32xf32>
    %4 = vector.multi_reduction <maximumf>, %3, %cst [1] : vector<32x32xf32> to vector<32xf32>
    %5 = vector.shape_cast %4 : vector<32xf32> to vector<32x1xf32>
    %6 = tpu.iota {dimensions = array<i32: 1>} : vector<32x32xi32>
    %7 = vector.broadcast %5 : vector<32x1xf32> to vector<32x32xf32>
    %8 = arith.cmpf oeq, %3, %7 : vector<32x32xf32>
    %c32_i32 = arith.constant 32 : i32
    %9 = vector.broadcast %c32_i32 : i32 to vector<32x32xi32>
    %10 = arith.select %8, %6, %9 : vector<32x32xi1>, vector<32x32xi32>
    %cst_2 = arith.constant dense<2147483647> : vector<32xi32>
    %11 = vector.multi_reduction <minsi>, %10, %cst_2 [1] : vector<32x32xi32> to vector<32xi32>
    %12 = vector.shape_cast %11 : vector<32xi32> to vector<32x1xi32>
    %c0_3 = arith.constant 0 : index
    %c0_4 = arith.constant 0 : index
    %13 = vector.load %arg2[%c0_3, %c0_4] : memref<32x1xi32, #tpu.memory_space<vmem>>, vector<32x1xi32>
    %14 = arith.cmpi eq, %12, %13 : vector<32x1xi32>
    %c32_i32_5 = arith.constant 32 : i32
    %15 = arith.muli %arg0, %c32_i32_5 : i32
    %16 = tpu.iota {dimensions = array<i32: 0>} : vector<32x1xi32>
    %17 = vector.broadcast %15 : i32 to vector<32x1xi32>
    %18 = arith.addi %17, %16 : vector<32x1xi32>
    %c32_i32_6 = arith.constant 32 : i32
    %19 = vector.broadcast %c32_i32_6 : i32 to vector<32x1xi32>
    %20 = arith.cmpi slt, %18, %19 : vector<32x1xi32>
    %21 = arith.andi %14, %20 : vector<32x1xi1>
    %cst_7 = arith.constant 1.000000e+00 : f32
    %cst_8 = arith.constant 0.000000e+00 : f32
    %22 = vector.broadcast %cst_7 : f32 to vector<32x1xf32>
    %23 = vector.broadcast %cst_8 : f32 to vector<32x1xf32>
    %24 = arith.select %21, %22, %23 : vector<32x1xi1>, vector<32x1xf32>
    %c0_9 = arith.constant 0 : index
    %c0_10 = arith.constant 0 : index
    %25 = vector.load %arg3[%c0_9, %c0_10] : memref<1x1xf32, #tpu.memory_space<vmem>>, vector<1x1xf32>
    %cst_11 = arith.constant dense<0.000000e+00> : vector<1xf32>
    %26 = vector.multi_reduction <add>, %24, %cst_11 [0] : vector<32x1xf32> to vector<1xf32>
    %27 = vector.shape_cast %26 : vector<1xf32> to vector<1x1xf32>
    %28 = arith.addf %25, %27 : vector<1x1xf32>
    %c0_12 = arith.constant 0 : index
    %c0_13 = arith.constant 0 : index
    %29 = vector.load %arg3[%c0_12, %c0_13] : memref<1x1xf32, #tpu.memory_space<vmem>>, vector<1x1xf32>
    tpu.vector_store %arg3[%c0_12, %c0_13], %28 {strides = array<i32>} : memref<1x1xf32, #tpu.memory_space<vmem>>, vector<1x1xf32>,
    return
  }
  func.func @transform_0(%arg0: i32) -> (i32, i32) {
    %c0_i32 = arith.constant 0 : i32
    %c0_i32_0 = arith.constant 0 : i32
    return %arg0, %c0_i32 : i32, i32
  }
  func.func @transform_1(%arg0: i32) -> (i32, i32) {
    %c0_i32 = arith.constant 0 : i32
    %c0_i32_0 = arith.constant 0 : i32
    return %arg0, %c0_i32 : i32, i32
  }
  func.func @transform_2(%arg0: i32) -> (i32, i32) {
    %c0_i32 = arith.constant 0 : i32
    %c0_i32_0 = arith.constant 0 : i32
    %c0_i32_1 = arith.constant 0 : i32
    return %c0_i32, %c0_i32_0 : i32, i32
  }
}

</mosaic_0001>

<bundles_post_ra>
// kernel: tpu_custom_call.1
= control target key start
LH: loop header
LB: loop body
LE: loop exit
PB: predicated region body
PF: predicated region fallthrough
CT: control target
= control target key end

     0   :  { %vm22_vm0 = vcmask 261120   ;;  %s261_s0 = inlined_call_operand.vmem [shape: f32[32,32], index: 0, kind: input, shape index: {}]   ;;  %s262_s1 = inlined_call_operand.vmem [shape: s32[32,1], index: 1, kind: input, shape index: {}]   ;;  %s263_s2 = inlined_call_operand.hbm [shape: f32[1,1], index: 2, kind: output, shape index: {}]  }
   0x1   :  { %v18_v0 = vld [vmem:[%s261_s0] sm:$0xff]  ;;  %v20_v1 = vld [vmem:[%s261_s0 + $0x10] sm:$0xff]  ;;  %v19_v2 = vld [vmem:[%s261_s0 + $0x8] sm:$0xff] }
   0x2   :  { %v23_v3 = vsel %vm22_vm0, %v18_v0, -inf  ;;  %v29_v4 = vsel %vm22_vm0, %v20_v1, -inf  ;;  %v21_v5 = vld [vmem:[%s261_s0 + $0x18] sm:$0xff] }
   0x3   :  { %7 = vsyncpa [#allocation3], 0  ;;  %24 = vmax.xlane.f32.xlu0 %v23_v3  ;;  %30 = vmax.xlane.f32.xlu1 %v29_v4  ;;  %v26_v6 = vsel %vm22_vm0, %v19_v2, -inf  ;;  %v32_v7 = vsel %vm22_vm0, %v21_v5, -inf  ;;  %v35_v8 = vlaneseq  ;;  %vm16_vm9 = vcmask 0   ;;  %v105_v53 = vld [vmem:[%s262_s1] sm:$0xff] }
   0x4   :  { %v194_v46 = vmov 0.0   ;;  %v106_v62 = vld [vmem:[%s262_s1 + $0x8] sm:$0xff]  ;;  %v107_v63 = vld [vmem:[%s262_s1 + $0x10] sm:$0xff]  ;;  %vm137_vm11 = vcmask 7168  }
   0x5   :  { %v36_v9 = vand.u32 127, %v35_v8  ;;  %17 = vst.msk [vmem:[#allocation2] sm:$0x1] %vm16_vm9, %v194_v46  ;;  %v108_v8 = vld [vmem:[%s262_s1 + $0x18] sm:$0xff]  ;;  %s195_s1 = smov [#allocation2]  }
   0x6   :  { %s160_s24 = sshll.u32 %s195_s1, 4  ;;  %s161_s24 = int_to_ptr.vmem [resolvable:$true] %s160_s24 }
   0x7   :  { %27 = vmax.xlane.f32.xlu0 %v26_v6  ;;  %33 = vmax.xlane.f32.xlu1 %v32_v7  ;;  %s170_s25 = scalar_lea.vmem %s161_s24, 16  ;;  %s174_s26 = scalar_lea.vmem %s161_s24, 32 }
   0x8   :  { %p171_p0 = scmp.ne.s32.totalorder %s161_s24, %s170_s25  ;;  %p175_p1 = scmp.lt.s32.totalorder %s161_s24, %s161_s24 }
   0x9   :  { %p176_p2 = scmp.lt.s32.totalorder %s174_s26, %s170_s25 }
   0xb   :  { %p177_p3 = por %p176_p2, %p175_p1 }
   0xd   :  { %p178_p4 = pnand %p177_p3, %p171_p0 }
  0x90   :  { %v25_v10 = vpop.xlane.xlu0 %24  ;;  %v31_v11 = vpop.xlane.xlu1 %30 }
  0x91   :  { %vm37_vm1 = vcmp.eq.f32.partialorder %v18_v0, %v25_v10  ;;  %vm39_vm2 = vcmp.eq.f32.partialorder %v20_v1, %v31_v11 }
  0x92   :  { %v41_v12 = vsel %vm37_vm1, %v36_v9, 32  ;;  %v43_v13 = vsel %vm39_vm2, %v36_v9, 32 }
  0x93   :  { %v45_v14 = vsel %vm22_vm0, %v41_v12, 2147483647  ;;  %v75_v15 = vsel %vm22_vm0, %v43_v13, 2147483647 }
  0x94   :  { %v28_v16 = vpop.xlane.xlu0 %27  ;;  %v34_v17 = vpop.xlane.xlu1 %33  ;;  %v47_v18 = vshra.s32 %v45_v14, 16  ;;  %v77_v19 = vshra.s32 %v75_v15, 16  ;;  %v46_v30 = vand.u32 65535, %v45_v14  ;;  %v76_v34 = vand.u32 65535, %v75_v15 }
  0x95   :  { %vm38_vm3 = vcmp.eq.f32.partialorder %v19_v2, %v28_v16  ;;  %vm40_vm4 = vcmp.eq.f32.partialorder %v21_v5, %v34_v17 }
  0x96   :  { %v42_v20 = vsel %vm38_vm3, %v36_v9, 32  ;;  %v44_v21 = vsel %vm40_vm4, %v36_v9, 32  ;;  %v49_v22 = vcvt.s32.f32 %v47_v18  ;;  %v79_v25 = vcvt.s32.f32 %v77_v19 }
  0x97   :  { %v60_v23 = vsel %vm22_vm0, %v42_v20, 2147483647  ;;  %v90_v24 = vsel %vm22_vm0, %v44_v21, 2147483647  ;;  %v48_v32 = vcvt.s32.f32 %v46_v30  ;;  %v78_v39 = vcvt.s32.f32 %v76_v34 }
  0x98   :  { %50 = vmin.xlane.f32.xlu0 %v49_v22  ;;  %v62_v26 = vshra.s32 %v60_v23, 16  ;;  %v92_v27 = vshra.s32 %v90_v24, 16  ;;  %v61_v33 = vand.u32 65535, %v60_v23  ;;  %v91_v40 = vand.u32 65535, %v90_v24  ;;  %v136_v23 = vld [vmem:[#allocation2] sm:$0x1] }
  0x9a   :  { %v64_v28 = vcvt.s32.f32 %v62_v26  ;;  %v94_v29 = vcvt.s32.f32 %v92_v27  ;;  %v63_v38 = vcvt.s32.f32 %v61_v33  ;;  %v93_v44 = vcvt.s32.f32 %v91_v40 }
  0x9c   :  { %80 = vmin.xlane.f32.xlu0 %v79_v25  ;;  %65 = vmin.xlane.f32.xlu1 %v64_v28 }
  0xa0   :  { %95 = vmin.xlane.f32.xlu1 %v94_v29 }
 0x125   :  { %v51_v31 = vpop.xlane.xlu0 %50 }
 0x126   :  { %vm52_vm5 = vcmp.eq.f32.partialorder %v49_v22, %v51_v31  ;;  %v57_v47 = vcvt.f32.s32 %v51_v31 }
 0x127   :  { %v53_v35 = vsel %vm52_vm5, %v48_v32, inf }
 0x128   :  { %54 = vmin.xlane.f32.xlu0 %v53_v35  ;;  %v58_v51 = vshll.u32 %v57_v47, 16 }
 0x129   :  { %v66_v36 = vpop.xlane.xlu1 %65  ;;  %v81_v37 = vpop.xlane.xlu0 %80 }
 0x12a   :  { %vm67_vm6 = vcmp.eq.f32.partialorder %v64_v28, %v66_v36  ;;  %vm82_vm7 = vcmp.eq.f32.partialorder %v79_v25, %v81_v37  ;;  %v72_v48 = vcvt.f32.s32 %v66_v36  ;;  %v87_v49 = vcvt.f32.s32 %v81_v37 }
 0x12b   :  { %v68_v41 = vsel %vm67_vm6, %v63_v38, inf  ;;  %v83_v42 = vsel %vm82_vm7, %v78_v39, inf }
 0x12c   :  { %69 = vmin.xlane.f32.xlu1 %v68_v41  ;;  %84 = vmin.xlane.f32.xlu0 %v83_v42  ;;  %v73_v55 = vshll.u32 %v72_v48, 16  ;;  %v88_v56 = vshll.u32 %v87_v49, 16 }
 0x12d   :  { %v96_v43 = vpop.xlane.xlu1 %95 }
 0x12e   :  { %vm97_vm8 = vcmp.eq.f32.partialorder %v94_v29, %v96_v43  ;;  %v102_v59 = vcvt.f32.s32 %v96_v43 }
 0x12f   :  { %v98_v45 = vsel %vm97_vm8, %v93_v44, inf }
 0x130   :  { %99 = vmin.xlane.f32.xlu1 %v98_v45  ;;  %v103_v4 = vshll.u32 %v102_v59, 16 }
 0x1b5   :  { %v55_v50 = vpop.xlane.xlu0 %54 }
 0x1b6   :  { %v56_v52 = vcvt.f32.s32 %v55_v50 }
 0x1b8   :  { %v59_v54 = vadd.s32 %v58_v51, %v56_v52 }
 0x1b9   :  { %v70_v57 = vpop.xlane.xlu1 %69  ;;  %v85_v58 = vpop.xlane.xlu0 %84 }
 0x1ba   :  { %vm109_vm10 = vcmp.eq.s32.totalorder %v59_v54, %v105_v53  ;;  %v71_v60 = vcvt.f32.s32 %v70_v57  ;;  %v86_v61 = vcvt.f32.s32 %v85_v58 }
 0x1bb   :  { %v132_v2 = vsel %vm109_vm10, 1.0, %v194_v46 }
 0x1bc   :  { %v74_v0 = vadd.s32 %v73_v55, %v71_v60  ;;  %v89_v1 = vadd.s32 %v88_v56, %v86_v61  ;;  %v138_v9 = vsel %vm137_vm11, %v132_v2, 0.0 }
 0x1bd   :  { %v100_v3 = vpop.xlane.xlu1 %99 }
 0x1be   :  { %vm110_vm12 = vcmp.eq.s32.totalorder %v74_v0, %v106_v62  ;;  %vm111_vm13 = vcmp.eq.s32.totalorder %v89_v1, %v107_v63  ;;  %v101_v5 = vcvt.f32.s32 %v100_v3 }
 0x1bf   :  { %v133_v6 = vsel %vm110_vm12, 1.0, %v194_v46  ;;  %v134_v7 = vsel %vm111_vm13, 1.0, %v194_v46 }
 0x1c0   :  { %v139_v10 = vsel %vm137_vm11, %v133_v6, 0.0  ;;  %v104_v11 = vadd.s32 %v103_v4, %v101_v5  ;;  %v141_v13 = vsel %vm137_vm11, %v134_v7, 0.0 }
 0x1c1   :  { %v140_v12 = vadd.f32 %v139_v10, %v138_v9 }
 0x1c2   :  { %vm112_vm14 = vcmp.eq.s32.totalorder %v104_v11, %v108_v8 }
 0x1c3   :  { %v142_v14 = vadd.f32 %v141_v13, %v140_v12  ;;  %v135_v15 = vsel %vm112_vm14, 1.0, %v194_v46 }
 0x1c4   :  { %v143_v16 = vsel %vm137_vm11, %v135_v15, 0.0 }
 0x1c5   :  { %v144_v17 = vadd.f32 %v143_v16, %v142_v14 }
 0x1c7   :  { %v145_v18 = vrot.slane %v144_v17, 4 }
 0x1c9   :  { %v146_v19 = vadd.f32 %v145_v18, %v144_v17 }
 0x1cb   :  { %v147_v20 = vrot.slane %v146_v19, 2 }
 0x1cd   :  { %v148_v21 = vadd.f32 %v147_v20, %v146_v19 }
 0x1cf   :  { %v149_v22 = vrot.slane %v148_v21, 1 }
 0x1d1   :  { %v150_v24 = vadd.f32 %v149_v22, %v148_v21 }
 0x1d3   :  { %v151_v25 = vadd.f32 %v150_v24, %v136_v23 }
 0x1d5   :  { %153 = vst.msk [vmem:[#allocation2] sm:$0x1] %vm16_vm9, %v151_v25 }
 0x1d6   :  { %181 = shalt.err (!%p178_p4)
}
 0x1d7   :  { %s182_s29 = scalar_lea.hbm %s263_s2, 16 }
 0x1d8   :  { %p183_p5 = scmp.ne.s32.totalorder %s263_s2, %s182_s29  ;;  %p186_p6 = scmp.lt.u32.totalorder %s182_s29, %s263_s2 }
 0x1da   :  { %p188_p7 = pnand %p186_p6, %p183_p5 }
 0x1dc   :  { %191 = shalt.err (!%p188_p7)
}
 0x1dd   :  { %163 = dma.vmem_to_hbm [thread:$0]  %s161_s24, 16, %s263_s2, [#allocation3]  }
 0x1de   :  { %192 = dma.done.wait [#allocation3], 16  }
 0x1df   :  { %193 = vsyncadd [#allocation3], 4294967280 }
 0x1e0   :  { %167 = vsyncpa [#allocation3], 1 }

</bundles_post_ra>
